<compile_context>
chip_gen: v6e
topology: v6e:2x2x1
jax: 0.10.0
libtpu: 0.0.40
codegen_flags: <defaults>
</compile_context>

<pallas_src>
import functools

import jax
import jax.numpy as jnp
from jax.experimental import pallas as pl
from jax.experimental.pallas import tpu as pltpu

_PDIST_EPS = 1e-6   # torch.nn.PairwiseDistance(p=2) default eps (added to the diff)
_NEG = -1.0e30      # lane padding for beta: exp(anything + _NEG) underflows to 0


def _round_up(x, m):
    return (x + m - 1) // m * m


def _layout(batch, dim, edges_num):
    """Static slab layout (all Python ints)."""
    row_nr = _round_up(max(batch, 1), 8)              # start of node-row region
    row_e = row_nr + _round_up(1 + dim, 8)            # start of edge region
    rows = _round_up(row_e + 2 + dim, 8)              # total sublanes
    lanes = max(128, _round_up(edges_num, 128), _round_up(batch, 128))
    node_lanes = min(lanes, _round_up(max(batch, 1), 128))
    return row_nr, row_e, rows, lanes, node_lanes


def _pack_slab(beta, z, edges, weights, nodes, *, lay):
    """Build the (rows, lanes) f32 slab for one batch (runs inside jit, fuses)."""
    row_nr, row_e, rows, lanes, _ = lay
    dim = z.shape[1]
    batch = nodes.shape[0]
    edges_num = edges.shape[1]
    f32 = jnp.float32

    beta = beta.astype(f32)
    z = z.astype(f32)
    weights = weights.astype(f32)

    b_sel = beta[nodes]                                   # (B,)
    z_sel = z[nodes]                                      # (B, D)

    slab = jnp.zeros((rows, lanes), f32)

    # region A: node columns  (row i = [beta_i, z_i0..z_i,D-1])
    slab = slab.at[0:batch, 0].set(b_sel)
    slab = slab.at[0:batch, 1:1 + dim].set(z_sel)

    # region B: node rows (beta lanes >= B padded with _NEG so exp() -> 0)
    beta_row = jnp.full((lanes,), _NEG, f32).at[0:batch].set(b_sel)
    slab = slab.at[row_nr, :].set(beta_row)
    slab = slab.at[row_nr + 1:row_nr + 1 + dim, 0:batch].set(z_sel.T)

    # region C: edges, pre-combined: [w, beta_u + beta_v, (z_u - z_v + eps)_c]
    slab = slab.at[row_e, 0:edges_num].set(weights)
    slab = slab.at[row_e + 1, 0:edges_num].set(beta[edges[0]] + beta[edges[1]])
    dz = (z[edges[0]] - z[edges[1]] + _PDIST_EPS).T       # (D, E)
    slab = slab.at[row_e + 2:row_e + 2 + dim, 0:edges_num].set(dz)
    return slab


def _ldm_nll_kernel(slab_ref, o_ref, *, dim, batch, row_nr, row_e, node_lanes):
    """One batch: slab_ref (rows, lanes) f32 -> o_ref (8, 128) f32 broadcast scalar."""
    # ----- non-link term: 0.5 * ( sum_{i,j} exp(beta_i+beta_j-||z_i-z_j||)
    #                              - sum_i exp(2*beta_i) ) -------------------
    beta_col = slab_ref[0:batch, 0:1]                              # (B, 1)
    beta_row = slab_ref[row_nr:row_nr + 1, 0:node_lanes]           # (1, Ln), NEG-padded
    beta_mat = beta_col + beta_row                                 # (B, Ln)

    sq = jnp.zeros_like(beta_mat)
    for c in range(dim):                                           # dim is small & static
        d_c = (slab_ref[0:batch, 1 + c:2 + c]
               - slab_ref[row_nr + 1 + c:row_nr + 2 + c, 0:node_lanes])
        sq = sq + d_c * d_c
    dist = jnp.sqrt(sq)                                            # diag exactly 0

    full_sum = jnp.sum(jnp.exp(beta_mat - dist))                   # padded lanes -> 0
    diag_sum = jnp.sum(jnp.exp(2.0 * beta_row))                    # padded lanes -> 0
    non_link = 0.5 * (full_sum - diag_sum)

    # ----- link term: sum_e w_e * ( (beta_u+beta_v) - ||z_u - z_v + eps|| ) --
    w = slab_ref[row_e:row_e + 1, :]                               # (1, L), pad w = 0
    bsum = slab_ref[row_e + 1:row_e + 2, :]                        # (1, L)
    esq = jnp.zeros_like(w)
    for c in range(dim):
        dz_c = slab_ref[row_e + 2 + c:row_e + 3 + c, :]
        esq = esq + dz_c * dz_c
    edist = jnp.sqrt(esq)                                          # pad lanes -> 0
    link = jnp.sum(w * (bsum - edist))

    nll = -(link - non_link)
    o_ref[...] = jnp.zeros((8, 128), jnp.float32) + nll            # dense, unmasked store


def _nll_from_slabs(slabs, *, dim, batch, lay):
    """slabs: (nb, rows, lanes) f32 -> (nb,) f32 negative log-likelihoods."""
    row_nr, row_e, rows, lanes, node_lanes = lay
    nb = slabs.shape[0]
    kernel = functools.partial(
        _ldm_nll_kernel, dim=dim, batch=batch,
        row_nr=row_nr, row_e=row_e, node_lanes=node_lanes)
    out = pl.pallas_call(
        kernel,
        grid=(nb,),
        out_shape=jax.ShapeDtypeStruct((nb, 8, 128), jnp.float32),
        in_specs=[pl.BlockSpec((None, rows, lanes), lambda b: (b, 0, 0))],
        out_specs=pl.BlockSpec((None, 8, 128), lambda b: (b, 0, 0)),
        compiler_params=pltpu.CompilerParams(dimension_semantics=("parallel",)),
    )(slabs)
    return out[:, 0, 0]


@jax.jit
def ldm_forward(beta, z, edges, weights, nodes):
    """Negative log-likelihood of the LDM, matching LDM.forward semantics."""
    dim = z.shape[1]
    batch = nodes.shape[0]
    edges_num = edges.shape[1]
    lay = _layout(batch, dim, edges_num)
    slab = _pack_slab(beta, z, edges, weights, nodes, lay=lay)[None]   # (1, R, L)
    return _nll_from_slabs(slab, dim=dim, batch=batch, lay=lay)[0]


@jax.jit
def ldm_forward_batched(beta, z, edges, weights, nodes):
    """Several independent LDM batches in ONE pallas_call.

    edges: (nb, 2, E) int32, weights: (nb, E) f32, nodes: (nb, B) int32.
    The leading grid axis is 'parallel' -> v7x shards batches over its two
    TensorCores; on v5e/v6e it amortises launch overhead.
    """
    dim = z.shape[1]
    nb, batch = nodes.shape
    edges_num = edges.shape[-1]
    lay = _layout(batch, dim, edges_num)
    slabs = jnp.stack(
        [_pack_slab(beta, z, edges[i], weights[i], nodes[i], lay=lay)
         for i in range(nb)], axis=0)                               # (nb, R, L)
    return _nll_from_slabs(slabs, dim=dim, batch=batch, lay=lay)


def ldm_forward_ref(beta, z, edges, weights, nodes):
    """Pure-JAX reference mirroring the PyTorch code."""
    b = beta[nodes]
    zz = z[nodes]
    beta_mat = b[None, :] + b[:, None]
    dist_mat = jnp.sqrt(jnp.maximum(
        jnp.sum((zz[:, None, :] - zz[None, :, :]) ** 2, axis=-1), 0.0))
    mask = jnp.triu(jnp.ones((b.shape[0], b.shape[0]), bool), k=1)
    non_link = jnp.sum(jnp.where(mask, jnp.exp(beta_mat - dist_mat), 0.0))

    bpair = beta[edges[0]] + beta[edges[1]]
    diff = z[edges[0]] - z[edges[1]] + _PDIST_EPS
    edist = jnp.sqrt(jnp.sum(diff * diff, axis=-1))
    link = jnp.sum(weights * (bpair - edist))
    return -(link - non_link)


if __name__ == "__main__":
    N = 32      # nodes_num
    D = 2       # latent dim (module default dim=2)
    E = 48      # number of edges

    key = jax.random.PRNGKey(0)
    kb, kz = jax.random.split(key)

    # Parameters exactly as in __init__: 2 * rand(...) - 1  (uniform in [-1, 1))
    beta = 2.0 * jax.random.uniform(kb, (N,), dtype=jnp.float32) - 1.0
    z = 2.0 * jax.random.uniform(kz, (N, D), dtype=jnp.float32) - 1.0

    # Deterministic synthetic graph (edge list, no self loops), unit weights,
    # batch = all nodes (sorted), as produced by __train_one_batch with full batch.
    e_idx = jnp.arange(E, dtype=jnp.int32)
    src = e_idx % N
    dst = (e_idx * 3 + 1) % N
    dst = jnp.where(dst == src, (dst + 1) % N, dst)
    edges = jnp.stack([src, dst], axis=0)                 # (2, E) int32
    weights = jnp.ones((E,), dtype=jnp.float32)
    nodes = jnp.arange(N, dtype=jnp.int32)                # sorted sampled nodes

    # ---- single-batch forward ------------------------------------------------
    nll = jax.block_until_ready(ldm_forward(beta, z, edges, weights, nodes))
    ref = jax.block_until_ready(ldm_forward_ref(beta, z, edges, weights, nodes))
    assert jnp.isfinite(nll), f"non-finite nll: {nll}"
    assert abs(float(nll) - float(ref)) <= 1e-3 * max(1.0, abs(float(ref))), (
        f"mismatch: pallas={float(nll)} ref={float(ref)}")

    # ---- several independent mini-batches in one call (parallel grid axis) --
    nb = 3
    B2 = 24
    edges_b, weights_b, nodes_b = [], [], []
    for t in range(nb):
        srcb = (e_idx * (t + 1)) % N
        dstb = (e_idx * 3 + 2 * t + 1) % N
        dstb = jnp.where(dstb == srcb, (dstb + 1) % N, dstb)
        edges_b.append(jnp.stack([srcb, dstb], axis=0))
        weights_b.append(jnp.full((E,), 1.0 + 0.25 * t, dtype=jnp.float32))
        perm = jax.random.permutation(jax.random.PRNGKey(100 + t), N)
        nodes_b.append(jnp.sort(perm[:B2]).astype(jnp.int32))
    edges_b = jnp.stack(edges_b, axis=0)                  # (nb, 2, E)
    weights_b = jnp.stack(weights_b, axis=0)              # (nb, E)
    nodes_b = jnp.stack(nodes_b, axis=0)                  # (nb, B2)

    nll_b = jax.block_until_ready(
        ldm_forward_batched(beta, z, edges_b, weights_b, nodes_b))
    for t in range(nb):
        ref_t = float(ldm_forward_ref(beta, z, edges_b[t], weights_b[t], nodes_b[t]))
        got_t = float(nll_b[t])
        assert jnp.isfinite(nll_b[t]), f"non-finite batched nll[{t}]: {got_t}"
        assert abs(got_t - ref_t) <= 1e-3 * max(1.0, abs(ref_t)), (
            f"batched mismatch @ {t}: pallas={got_t} ref={ref_t}")

    print("KERNEL_OK")
</pallas_src>

<mosaic_0001>
module attributes {stable_mosaic.version = 11 : i64} {
  func.func @_ldm_nll_kernel(%arg0: i32, %arg1: memref<1x48x128xf32, #tpu.memory_space<vmem>>, %arg2: memref<1x8x128xf32, #tpu.memory_space<vmem>>) attributes {dimension_semantics = [#tpu.dimension_semantics<parallel>], iteration_bounds = array<i64: 1>, scalar_prefetch = 0 : i64, scratch_operands = 0 : i64, tpu.core_type = #tpu.core_type<tc>, window_params = [{transform_indices = @transform_0, window_bounds = array<i64: 1, 48, 128>}, {transform_indices = @transform_1, window_bounds = array<i64: 1, 8, 128>}]} {
    %c0 = arith.constant 0 : index
    %c0_0 = arith.constant 0 : index
    %c0_1 = arith.constant 0 : index
    %0 = vector.load %arg1[%c0, %c0_0, %c0_1] : memref<1x48x128xf32, #tpu.memory_space<vmem>>, vector<1x32x1xf32>
    %1 = vector.shape_cast %0 : vector<1x32x1xf32> to vector<32x1xf32>
    %c0_2 = arith.constant 0 : index
    %c32 = arith.constant 32 : index
    %c0_3 = arith.constant 0 : index
    %2 = vector.load %arg1[%c0_2, %c32, %c0_3] : memref<1x48x128xf32, #tpu.memory_space<vmem>>, vector<1x1x128xf32>
    %3 = vector.shape_cast %2 : vector<1x1x128xf32> to vector<1x128xf32>
    %4 = vector.broadcast %1 : vector<32x1xf32> to vector<32x128xf32>
    %5 = vector.broadcast %3 : vector<1x128xf32> to vector<32x128xf32>
    %6 = arith.addf %4, %5 : vector<32x128xf32>
    %cst = arith.constant 0.000000e+00 : f32
    %7 = vector.broadcast %cst : f32 to vector<32x128xf32>
    %c0_4 = arith.constant 0 : index
    %c0_5 = arith.constant 0 : index
    %c1 = arith.constant 1 : index
    %8 = vector.load %arg1[%c0_4, %c0_5, %c1] : memref<1x48x128xf32, #tpu.memory_space<vmem>>, vector<1x32x1xf32>
    %9 = vector.shape_cast %8 : vector<1x32x1xf32> to vector<32x1xf32>
    %c0_6 = arith.constant 0 : index
    %c33 = arith.constant 33 : index
    %c0_7 = arith.constant 0 : index
    %10 = vector.load %arg1[%c0_6, %c33, %c0_7] : memref<1x48x128xf32, #tpu.memory_space<vmem>>, vector<1x1x128xf32>
    %11 = vector.shape_cast %10 : vector<1x1x128xf32> to vector<1x128xf32>
    %12 = vector.broadcast %9 : vector<32x1xf32> to vector<32x128xf32>
    %13 = vector.broadcast %11 : vector<1x128xf32> to vector<32x128xf32>
    %14 = arith.subf %12, %13 : vector<32x128xf32>
    %15 = arith.mulf %14, %14 : vector<32x128xf32>
    %16 = arith.addf %7, %15 : vector<32x128xf32>
    %c0_8 = arith.constant 0 : index
    %c0_9 = arith.constant 0 : index
    %c2 = arith.constant 2 : index
    %17 = vector.load %arg1[%c0_8, %c0_9, %c2] : memref<1x48x128xf32, #tpu.memory_space<vmem>>, vector<1x32x1xf32>
    %18 = vector.shape_cast %17 : vector<1x32x1xf32> to vector<32x1xf32>
    %c0_10 = arith.constant 0 : index
    %c34 = arith.constant 34 : index
    %c0_11 = arith.constant 0 : index
    %19 = vector.load %arg1[%c0_10, %c34, %c0_11] : memref<1x48x128xf32, #tpu.memory_space<vmem>>, vector<1x1x128xf32>
    %20 = vector.shape_cast %19 : vector<1x1x128xf32> to vector<1x128xf32>
    %21 = vector.broadcast %18 : vector<32x1xf32> to vector<32x128xf32>
    %22 = vector.broadcast %20 : vector<1x128xf32> to vector<32x128xf32>
    %23 = arith.subf %21, %22 : vector<32x128xf32>
    %24 = arith.mulf %23, %23 : vector<32x128xf32>
    %25 = arith.addf %16, %24 : vector<32x128xf32>
    %26 = math.sqrt %25 : vector<32x128xf32>
    %27 = arith.subf %6, %26 : vector<32x128xf32>
    %28 = math.exp %27 : vector<32x128xf32>
    %29 = vector.shape_cast %28 : vector<32x128xf32> to vector<1x32x128xf32>
    %cst_12 = arith.constant dense<0.000000e+00> : vector<1xf32>
    %30 = vector.multi_reduction <add>, %29, %cst_12 [1, 2] : vector<1x32x128xf32> to vector<1xf32>
    %31 = vector.shape_cast %30 : vector<1xf32> to vector<1x1x1xf32>
    %32 = vector.extract %31[0, 0, 0] : f32 from vector<1x1x1xf32>
    %cst_13 = arith.constant 2.000000e+00 : f32
    %33 = vector.broadcast %cst_13 : f32 to vector<1x128xf32>
    %34 = arith.mulf %33, %3 : vector<1x128xf32>
    %35 = math.exp %34 : vector<1x128xf32>
    %36 = vector.shape_cast %35 : vector<1x128xf32> to vector<1x1x128xf32>
    %cst_14 = arith.constant dense<0.000000e+00> : vector<1xf32>
    %37 = vector.multi_reduction <add>, %36, %cst_14 [1, 2] : vector<1x1x128xf32> to vector<1xf32>
    %38 = vector.shape_cast %37 : vector<1xf32> to vector<1x1x1xf32>
    %39 = vector.extract %38[0, 0, 0] : f32 from vector<1x1x1xf32>
    %40 = arith.subf %32, %39 : f32
    %cst_15 = arith.constant 5.000000e-01 : f32
    %41 = arith.mulf %cst_15, %40 : f32
    %c0_16 = arith.constant 0 : index
    %c40 = arith.constant 40 : index
    %c0_17 = arith.constant 0 : index
    %42 = vector.load %arg1[%c0_16, %c40, %c0_17] : memref<1x48x128xf32, #tpu.memory_space<vmem>>, vector<1x1x128xf32>
    %43 = vector.shape_cast %42 : vector<1x1x128xf32> to vector<1x128xf32>
    %c0_18 = arith.constant 0 : index
    %c41 = arith.constant 41 : index
    %c0_19 = arith.constant 0 : index
    %44 = vector.load %arg1[%c0_18, %c41, %c0_19] : memref<1x48x128xf32, #tpu.memory_space<vmem>>, vector<1x1x128xf32>
    %45 = vector.shape_cast %44 : vector<1x1x128xf32> to vector<1x128xf32>
    %cst_20 = arith.constant 0.000000e+00 : f32
    %46 = vector.broadcast %cst_20 : f32 to vector<1x128xf32>
    %c0_21 = arith.constant 0 : index
    %c42 = arith.constant 42 : index
    %c0_22 = arith.constant 0 : index
    %47 = vector.load %arg1[%c0_21, %c42, %c0_22] : memref<1x48x128xf32, #tpu.memory_space<vmem>>, vector<1x1x128xf32>
    %48 = vector.shape_cast %47 : vector<1x1x128xf32> to vector<1x128xf32>
    %49 = arith.mulf %48, %48 : vector<1x128xf32>
    %50 = arith.addf %46, %49 : vector<1x128xf32>
    %c0_23 = arith.constant 0 : index
    %c43 = arith.constant 43 : index
    %c0_24 = arith.constant 0 : index
    %51 = vector.load %arg1[%c0_23, %c43, %c0_24] : memref<1x48x128xf32, #tpu.memory_space<vmem>>, vector<1x1x128xf32>
    %52 = vector.shape_cast %51 : vector<1x1x128xf32> to vector<1x128xf32>
    %53 = arith.mulf %52, %52 : vector<1x128xf32>
    %54 = arith.addf %50, %53 : vector<1x128xf32>
    %55 = math.sqrt %54 : vector<1x128xf32>
    %56 = arith.subf %45, %55 : vector<1x128xf32>
    %57 = arith.mulf %43, %56 : vector<1x128xf32>
    %58 = vector.shape_cast %57 : vector<1x128xf32> to vector<1x1x128xf32>
    %cst_25 = arith.constant dense<0.000000e+00> : vector<1xf32>
    %59 = vector.multi_reduction <add>, %58, %cst_25 [1, 2] : vector<1x1x128xf32> to vector<1xf32>
    %60 = vector.shape_cast %59 : vector<1xf32> to vector<1x1x1xf32>
    %61 = vector.extract %60[0, 0, 0] : f32 from vector<1x1x1xf32>
    %62 = arith.subf %61, %41 : f32
    %cst_26 = arith.constant 0.000000e+00 : f32
    %63 = arith.subf %cst_26, %62 : f32
    %cst_27 = arith.constant 0.000000e+00 : f32
    %64 = vector.broadcast %cst_27 : f32 to vector<8x128xf32>
    %65 = vector.broadcast %63 : f32 to vector<8x128xf32>
    %66 = arith.addf %64, %65 : vector<8x128xf32>
    %c0_28 = arith.constant 0 : index
    %c0_29 = arith.constant 0 : index
    %c0_30 = arith.constant 0 : index
    %67 = vector.load %arg2[%c0_28, %c0_29, %c0_30] : memref<1x8x128xf32, #tpu.memory_space<vmem>>, vector<1x8x128xf32>
    %68 = vector.shape_cast %67 : vector<1x8x128xf32> to vector<8x128xf32>
    %69 = vector.shape_cast %66 : vector<8x128xf32> to vector<1x8x128xf32>
    tpu.vector_store %arg2[%c0_28, %c0_29, %c0_30], %69 {strides = array<i32>} : memref<1x8x128xf32, #tpu.memory_space<vmem>>, vector<1x8x128xf32>,
    return
  }
  func.func @transform_0(%arg0: i32) -> (i32, i32, i32) {
    %c0_i32 = arith.constant 0 : i32
    %c0_i32_0 = arith.constant 0 : i32
    %c0_i32_1 = arith.constant 0 : i32
    return %arg0, %c0_i32, %c0_i32_0 : i32, i32, i32
  }
  func.func @transform_1(%arg0: i32) -> (i32, i32, i32) {
    %c0_i32 = arith.constant 0 : i32
    %c0_i32_0 = arith.constant 0 : i32
    %c0_i32_1 = arith.constant 0 : i32
    return %arg0, %c0_i32, %c0_i32_0 : i32, i32, i32
  }
}

</mosaic_0001>

<bundles_post_ra>
// kernel: ldm_forward.1
= control target key start
LH: loop header
LB: loop body
LE: loop exit
PB: predicated region body
PF: predicated region fallthrough
CT: control target
= control target key end

     0   :  { %v247_v0 = vmov 2   ;;  %v248_v1 = vmov 1   ;;  %v249_v6 = vmov 0   ;;  %vm162_vm2 = vcmask 1040384   ;;  %s296_s0 = inlined_call_operand.vmem [shape: f32[1,48,128], index: 0, kind: input, shape index: {}]   ;;  %s297_s1 = inlined_call_operand.vmem [shape: f32[1,8,128], index: 1, kind: output, shape index: {}]  }
   0x1   :  { %223 = vset.pattern.permute.xlu1 %v247_v0  ;;  %222 = vset.pattern.permute.xlu0 %v248_v1  ;;  %v8_v2 = vld [vmem:[%s296_s0] sm:$0xff]  ;;  %v9_v3 = vld [vmem:[%s296_s0 + $0x8] sm:$0xff]  ;;  %v10_v4 = vld [vmem:[%s296_s0 + $0x10] sm:$0xff]  ;;  %v33_v40 = vlaneseq }
   0x2   :  { %76 = vperm.xlu1 %223, %v8_v2   ;;  %43 = vperm.xlu0 %222, %v8_v2   ;;  %v11_v5 = vld [vmem:[%s296_s0 + $0x18] sm:$0xff]  ;;  %v177_v7 = vld [vmem:[%s296_s0 + $0x2a] sm:$0x1]  ;;  %v180_v8 = vld [vmem:[%s296_s0 + $0x2b] sm:$0x1] }
   0x3   :  { %v12_v9 = vld [vmem:[%s296_s0 + $0x20] sm:$0x1]  ;;  %v178_v10 = vmul.f32 %v177_v7, %v177_v7  ;;  %v181_v11 = vmul.f32 %v180_v8, %v180_v8  ;;  %v176_v18 = vld [vmem:[%s296_s0 + $0x29] sm:$0x1]  ;;  %v175_v22 = vld [vmem:[%s296_s0 + $0x28] sm:$0x1] }
   0x4   :  { %v159_v12 = vmul.f32 2.0, %v12_v9  ;;  %v212_v27 = vld [vmem:[%s296_s0 + $0x22] ss:$0 sm:$0xff]  ;;  %v211_v28 = vld [vmem:[%s296_s0 + $0x21] ss:$0 sm:$0xff]  ;;  %v34_v48 = vshrl.u32 %v33_v40, 7 }
   0x5   :  { %v182_v13 = vadd.f32 %v181_v11, %v178_v10 }
   0x6   :  { %80 = vperm.xlu1 %223, %v9_v3   ;;  %47 = vperm.xlu0 %222, %v9_v3   ;;  %v160_v14 = vmul.f32 1.442695, %v159_v12  ;;  %v35_v56 = vsub.s32 0, %v34_v48 }
   0x7   :  { %227 = vrsqrt.f32 %v182_v13  ;;  %vm185_vm0 = vcmp.eq.f32.partialorder %v182_v13, inf  ;;  %v188_v16 = vand.u32 2147483648, %v182_v13  ;;  %vm187_vm1 = vcmp.eq.f32.partialorder %v182_v13, 0.0 }
   0x8   :  { %229 = vpow2.f32 %v160_v14  ;;  %v36_v60 = vrot.slane %v12_v9, %v35_v56 }
   0xa   :  { %84 = vperm.xlu1 %223, %v10_v4   ;;  %51 = vperm.xlu0 %222, %v10_v4  }
   0xe   :  { %88 = vperm.xlu1 %223, %v11_v5   ;;  %55 = vperm.xlu0 %222, %v11_v5  }
  0x12   :  { %224 = vset.pattern.permute.xlu0 %v249_v6  ;;  %225 = vset.pattern.permute.xlu1 %v249_v6 }
  0x13   :  { %15 = vperm.xlu0 %224, %v8_v2   ;;  %20 = vperm.xlu1 %225, %v9_v3  }
  0x14   :  { %v228_v15 = vpop.eup %227 }
  0x15   :  { %v184_v17 = vmul.f32 %v228_v15, %v182_v13  ;;  %v230_v21 = vpop.eup %229 }
  0x16   :  { %v163_v24 = vsel %vm162_vm2, %v230_v21, 0.0 }
  0x17   :  { %25 = vperm.xlu1 %225, %v10_v4   ;;  %30 = vperm.xlu0 %224, %v11_v5   ;;  %v186_v19 = vsel %vm185_vm0, %v182_v13, %v184_v17 }
  0x18   :  { %v189_v20 = vsel %vm187_vm1, %v188_v16, %v186_v19 }
  0x19   :  { %v190_v23 = vsub.f32 %v176_v18, %v189_v20 }
  0x1b   :  { %226 = vset.pattern.permute.xlu0 %v247_v0  ;;  %v191_v25 = vmul.f32 %v190_v23, %v175_v22 }
  0x1d   :  { %v192_v26 = vsel %vm162_vm2, %v191_v25, 0.0 }
  0x36   :  { %164 = vadd.xlane.f32.xlu0 %v163_v24 }
  0x3a   :  { %193 = vadd.xlane.f32.xlu0 %v192_v26 }
  0x7d   :  { %v77_v29 = vpop.permute.xlu1 %76  ;;  %v44_v30 = vpop.permute.xlu0 %43 }
  0x7e   :  { %v95_v31 = vsub.f32 %v77_v29, %v212_v27  ;;  %v62_v32 = vsub.f32 %v44_v30, %v211_v28 }
  0x80   :  { %v99_v33 = vmul.f32 %v95_v31, %v95_v31  ;;  %v66_v34 = vmul.f32 %v62_v32, %v62_v32 }
  0x81   :  { %v81_v35 = vpop.permute.xlu1 %80  ;;  %v48_v36 = vpop.permute.xlu0 %47 }
  0x82   :  { %v103_v37 = vadd.f32 %v99_v33, %v66_v34  ;;  %v96_v38 = vsub.f32 %v81_v35, %v212_v27  ;;  %v63_v39 = vsub.f32 %v48_v36, %v211_v28 }
  0x84   :  { %231 = vrsqrt.f32 %v103_v37  ;;  %v100_v41 = vmul.f32 %v96_v38, %v96_v38  ;;  %v67_v42 = vmul.f32 %v63_v39, %v63_v39  ;;  %vm109_vm3 = vcmp.eq.f32.partialorder %v103_v37, inf }
  0x85   :  { %v85_v43 = vpop.permute.xlu1 %84  ;;  %v52_v44 = vpop.permute.xlu0 %51  ;;  %v112_v1 = vand.u32 2147483648, %v103_v37  ;;  %vm111_vm4 = vcmp.eq.f32.partialorder %v103_v37, 0.0 }
  0x86   :  { %v104_v45 = vadd.f32 %v100_v41, %v67_v42  ;;  %v97_v46 = vsub.f32 %v85_v43, %v212_v27  ;;  %v64_v47 = vsub.f32 %v52_v44, %v211_v28 }
  0x88   :  { %233 = vrsqrt.f32 %v104_v45  ;;  %v101_v49 = vmul.f32 %v97_v46, %v97_v46  ;;  %v68_v50 = vmul.f32 %v64_v47, %v64_v47  ;;  %vm116_vm5 = vcmp.eq.f32.partialorder %v104_v45, inf }
  0x89   :  { %v89_v51 = vpop.permute.xlu1 %88  ;;  %v56_v52 = vpop.permute.xlu0 %55  ;;  %v119_v10 = vand.u32 2147483648, %v104_v45  ;;  %vm118_vm6 = vcmp.eq.f32.partialorder %v104_v45, 0.0 }
  0x8a   :  { %v105_v53 = vadd.f32 %v101_v49, %v68_v50  ;;  %v98_v54 = vsub.f32 %v89_v51, %v212_v27  ;;  %v65_v55 = vsub.f32 %v56_v52, %v211_v28 }
  0x8c   :  { %235 = vrsqrt.f32 %v105_v53  ;;  %v102_v57 = vmul.f32 %v98_v54, %v98_v54  ;;  %v69_v58 = vmul.f32 %v65_v55, %v65_v55  ;;  %vm123_vm7 = vcmp.eq.f32.partialorder %v105_v53, inf }
  0x8d   :  { %v126_v17 = vand.u32 2147483648, %v105_v53  ;;  %vm125_vm8 = vcmp.eq.f32.partialorder %v105_v53, 0.0 }
  0x8e   :  { %v106_v59 = vadd.f32 %v102_v57, %v69_v58  ;;  %v16_v61 = vpop.permute.xlu0 %15  ;;  %v21_v2 = vpop.permute.xlu1 %20 }
  0x8f   :  { %v37_v0 = vadd.f32 %v36_v60, %v16_v61  ;;  %v38_v7 = vadd.f32 %v36_v60, %v21_v2 }
  0x90   :  { %237 = vrsqrt.f32 %v106_v59  ;;  %vm130_vm9 = vcmp.eq.f32.partialorder %v106_v59, inf  ;;  %v133_v26 = vand.u32 2147483648, %v106_v59  ;;  %vm132_vm10 = vcmp.eq.f32.partialorder %v106_v59, 0.0 }
  0x91   :  { %v232_v62 = vpop.eup %231 }
  0x92   :  { %v108_v63 = vmul.f32 %v232_v62, %v103_v37  ;;  %v26_v14 = vpop.permute.xlu1 %25  ;;  %v31_v23 = vpop.permute.xlu0 %30 }
  0x93   :  { %v39_v19 = vadd.f32 %v36_v60, %v26_v14  ;;  %v40_v29 = vadd.f32 %v36_v60, %v31_v23 }
  0x94   :  { %v110_v3 = vsel %vm109_vm3, %v103_v37, %v108_v63 }
  0x95   :  { %v234_v4 = vpop.eup %233  ;;  %v113_v5 = vsel %vm111_vm4, %v112_v1, %v110_v3 }
  0x96   :  { %v135_v6 = vsub.f32 %v37_v0, %v113_v5  ;;  %v115_v8 = vmul.f32 %v234_v4, %v104_v45 }
  0x98   :  { %v117_v11 = vsel %vm116_vm5, %v104_v45, %v115_v8  ;;  %v139_v12 = vmul.f32 1.442695, %v135_v6 }
  0x99   :  { %v236_v9 = vpop.eup %235  ;;  %v120_v13 = vsel %vm118_vm6, %v119_v10, %v117_v11 }
  0x9a   :  { %v136_v15 = vsub.f32 %v38_v7, %v120_v13  ;;  %v122_v16 = vmul.f32 %v236_v9, %v105_v53  ;;  %239 = vpow2.f32 %v139_v12 }
  0x9c   :  { %v141_v18 = vmul.f32 1.442695, %v136_v15  ;;  %v124_v20 = vsel %vm123_vm7, %v105_v53, %v122_v16 }
  0x9d   :  { %v238_v21 = vpop.eup %237  ;;  %v127_v22 = vsel %vm125_vm8, %v126_v17, %v124_v20 }
  0x9e   :  { %241 = vpow2.f32 %v141_v18  ;;  %v137_v24 = vsub.f32 %v39_v19, %v127_v22  ;;  %v129_v25 = vmul.f32 %v238_v21, %v106_v59 }
  0xa0   :  { %v143_v27 = vmul.f32 1.442695, %v137_v24  ;;  %v131_v28 = vsel %vm130_vm9, %v106_v59, %v129_v25 }
  0xa1   :  { %v134_v30 = vsel %vm132_vm10, %v133_v26, %v131_v28 }
  0xa2   :  { %243 = vpow2.f32 %v143_v27  ;;  %v138_v31 = vsub.f32 %v40_v29, %v134_v30 }
  0xa4   :  { %v145_v32 = vmul.f32 1.442695, %v138_v31 }
  0xa6   :  { %245 = vpow2.f32 %v145_v32 }
  0xa7   :  { %v240_v33 = vpop.eup %239 }
  0xab   :  { %v242_v34 = vpop.eup %241 }
  0xac   :  { %v147_v35 = vadd.f32 %v242_v34, %v240_v33 }
  0xaf   :  { %v244_v36 = vpop.eup %243 }
  0xb0   :  { %v148_v37 = vadd.f32 %v244_v36, %v147_v35 }
  0xb3   :  { %v246_v38 = vpop.eup %245 }
  0xb4   :  { %v149_v39 = vadd.f32 %v246_v38, %v148_v37 }
  0xb6   :  { %150 = vadd.xlane.f32.xlu1 %v149_v39 }
  0xbf   :  { %v165_v40 = vpop.xlane.xlu0 %164 }
  0xc0   :  { %v166_v42 = vrot.slane %v165_v40, 4 }
  0xc2   :  { %v167_v44 = vadd.f32 %v166_v42, %v165_v40 }
  0xc3   :  { %v194_v41 = vpop.xlane.xlu0 %193 }
  0xc4   :  { %v195_v43 = vrot.slane %v194_v41, 4  ;;  %v168_v46 = vrot.slane %v167_v44, 2 }
  0xc6   :  { %v196_v45 = vadd.f32 %v195_v43, %v194_v41  ;;  %v169_v51 = vadd.f32 %v168_v46, %v167_v44 }
  0xc8   :  { %v197_v48 = vrot.slane %v196_v45, 2  ;;  %v170_v55 = vrot.slane %v169_v51, 1 }
  0xca   :  { %v198_v52 = vadd.f32 %v197_v48, %v196_v45  ;;  %v171_v59 = vadd.f32 %v170_v55, %v169_v51 }
  0xcc   :  { %v199_v57 = vrot.slane %v198_v52, 1 }
  0xce   :  { %v200_v60 = vadd.f32 %v199_v57, %v198_v52 }
 0x13f   :  { %v151_v47 = vpop.xlane.xlu1 %150 }
 0x140   :  { %v152_v49 = vrot.slane %v151_v47, 4 }
 0x142   :  { %v153_v50 = vadd.f32 %v152_v49, %v151_v47 }
 0x144   :  { %v154_v53 = vrot.slane %v153_v50, 2 }
 0x146   :  { %v155_v54 = vadd.f32 %v154_v53, %v153_v50 }
 0x148   :  { %v156_v56 = vrot.slane %v155_v54, 1 }
 0x14a   :  { %v157_v58 = vadd.f32 %v156_v56, %v155_v54 }
 0x14c   :  { %213 = vpush %v157_v58 }
 0x14d   :  { %215 = vpush %v171_v59 }
 0x14e   :  { %217 = vpush %v200_v60 }
 0x17d   :  { %s214_s0 = spop %213 }
 0x17e   :  { %s216_s28 = spop %215 }
 0x17f   :  { %s173_s29 = ssub.f32 %s214_s0, %s216_s28  ;;  %s218_s2 = spop %217 }
 0x181   :  { %s174_s30 = smul.f32 0.5, %s173_s29 }
 0x183   :  { %s202_s3 = ssub.f32 %s218_s2, %s174_s30 }
 0x185   :  { %s203_s4 = ssub.f32 0.0, %s202_s3 }
 0x187   :  { %v204_v61 = vstv %s203_s4 }
 0x188   :  { %206 = vst [vmem:[%s297_s1] sm:$0xff] %v204_v61 }

</bundles_post_ra>
